<compile_context>
chip_gen: v7x
topology: tpu7x:2x2x1
jax: 0.10.0
libtpu: 0.0.40
codegen_flags: <defaults>
</compile_context>

<pallas_src>
from functools import partial

import jax
import jax.numpy as jnp
from jax.experimental import pallas as pl
from jax.experimental.pallas import tpu as pltpu


def _round_up(a, b):
    return (a + b - 1) // b * b


# --------------------------------------------------------------------------- #
# Kernel: three fused matmul stages, all operands resident in VMEM per tile.  #
# --------------------------------------------------------------------------- #
def duel_dqn_fused_kernel(x_ref, w1_ref, b1_ref, w2_ref, b2_ref, w3_ref, b3_ref,
                          q_ref):
    x = x_ref[...]

    # lin = ReLU(x @ W1 + b1)                                   (TB, 64)
    lin = jnp.dot(x, w1_ref[...], preferred_element_type=jnp.float32)
    lin = jnp.maximum(lin + b1_ref[...], 0.0)

    # both branch hidden layers in one matmul:
    # hidden[:, :256] = sv_h, hidden[:, 256:] = av_h            (TB, 512)
    hid = jnp.dot(lin, w2_ref[...], preferred_element_type=jnp.float32)
    hid = jnp.maximum(hid + b2_ref[...], 0.0)

    # dueling combine pre-folded into (512, 128) weights:
    # q = V + (A - mean_a A) == hidden @ W3 + b3                (TB, 128 lane-padded)
    q = jnp.dot(hid, w3_ref[...], preferred_element_type=jnp.float32)
    q_ref[...] = (q + b3_ref[...]).astype(q_ref.dtype)


# --------------------------------------------------------------------------- #
# Wrapper                                                                     #
# --------------------------------------------------------------------------- #
def duel_dqn_forward(x, packed, *, num_actions, block_batch=256):
    """x: (B, state_size) f32.  packed: dict from pack_params().  Returns (B, A)."""
    w1, b1 = packed["w1"], packed["b1"]
    w2, b2 = packed["w2"], packed["b2"]
    w3, b3 = packed["w3"], packed["b3"]

    B, S = x.shape
    A_pad = w3.shape[1]

    # match weight storage dtype (f32 or bf16); accumulation is always f32
    x = x.astype(w1.dtype)

    # batch tile: multiple of 8 sublanes, clamped for tiny batches
    tb = min(block_batch, max(8, _round_up(B, 8)))
    B_pad = _round_up(B, tb)
    if B_pad != B:
        x = jnp.pad(x, ((0, B_pad - B), (0, 0)))

    grid = (B_pad // tb,)

    def full(shape):
        return pl.BlockSpec(shape, lambda i: (0,) * len(shape))

    q_pad = pl.pallas_call(
        duel_dqn_fused_kernel,
        out_shape=jax.ShapeDtypeStruct((B_pad, A_pad), jnp.float32),
        grid=grid,
        in_specs=[
            pl.BlockSpec((tb, S), lambda i: (i, 0)),   # x: tiled over batch
            full(w1.shape), full(b1.shape),            # weights: broadcast to all tiles
            full(w2.shape), full(b2.shape),
            full(w3.shape), full(b3.shape),
        ],
        out_specs=pl.BlockSpec((tb, A_pad), lambda i: (i, 0)),
        compiler_params=pltpu.CompilerParams(
            dimension_semantics=("parallel",)),        # shards batch across v7x's 2 TCs
    )(x, w1, b1, w2, b2, w3, b3)

    return q_pad[:B, :num_actions]


# --------------------------------------------------------------------------- #
# Parameter init (PyTorch-Linear-like) and host-side fusion / folding.        #
# --------------------------------------------------------------------------- #
def init_params(key, state_size, num_actions):
    """Per-layer params matching the PyTorch module layout (W stored (in, out))."""
    def linear(k, fan_in, fan_out):
        kw, kb = jax.random.split(k)
        bound = 1.0 / jnp.sqrt(jnp.float32(fan_in))
        w = jax.random.uniform(kw, (fan_in, fan_out), jnp.float32, -bound, bound)
        b = jax.random.uniform(kb, (1, fan_out), jnp.float32, -bound, bound)
        return w, b

    ks = jax.random.split(key, 5)
    lin_w, lin_b = linear(ks[0], state_size, 64)
    sv1_w, sv1_b = linear(ks[1], 64, 256)
    sv2_w, sv2_b = linear(ks[2], 256, 1)
    av1_w, av1_b = linear(ks[3], 64, 256)
    av2_w, av2_b = linear(ks[4], 256, num_actions)
    return dict(lin_w=lin_w, lin_b=lin_b,
                sv1_w=sv1_w, sv1_b=sv1_b, sv2_w=sv2_w, sv2_b=sv2_b,
                av1_w=av1_w, av1_b=av1_b, av2_w=av2_w, av2_b=av2_b)


def pack_params(p, num_actions, dtype=jnp.float32):
    """Fuse branch hidden layers, fold dueling combine into final weights, lane-pad."""
    H = p["sv1_w"].shape[1]                      # 256
    A = num_actions
    A_pad = max(128, _round_up(A, 128))          # lane-dense output width

    # stage 1: shared trunk
    w1, b1 = p["lin_w"], p["lin_b"]

    # stage 2: fused branch hidden layer  (64, 512); lanes [0:H]=sv_h, [H:2H]=av_h
    w2 = jnp.concatenate([p["sv1_w"], p["av1_w"]], axis=1)
    b2 = jnp.concatenate([p["sv1_b"], p["av1_b"]], axis=1)

    # stage 3: fold  q = V + (A - mean_a A)  into one (512, A) matmul.
    #   sv_h rows: sv2_w broadcast across all action columns (V added to every action)
    #   av_h rows: av2_w - column-mean  (centering folded into the weights)
    w3_sv = jnp.broadcast_to(p["sv2_w"], (H, A))
    w3_av = p["av2_w"] - jnp.mean(p["av2_w"], axis=1, keepdims=True)
    w3 = jnp.concatenate([w3_sv, w3_av], axis=0)                       # (512, A)
    b3 = p["sv2_b"] + (p["av2_b"] - jnp.mean(p["av2_b"], axis=1, keepdims=True))

    # zero-pad the output dim to 128 lanes AFTER folding (padded cols never enter a mean)
    w3 = jnp.pad(w3, ((0, 0), (0, A_pad - A)))
    b3 = jnp.pad(b3, ((0, 0), (0, A_pad - A)))

    return dict(w1=w1.astype(dtype), b1=b1.astype(dtype),
                w2=w2.astype(dtype), b2=b2.astype(dtype),
                w3=w3.astype(dtype), b3=b3.astype(dtype))


def duel_dqn_ref(x, p):
    """Pure-JAX reference of the PyTorch forward (unfused/unfolded) for verification."""
    lin = jax.nn.relu(x @ p["lin_w"] + p["lin_b"])
    sv = jax.nn.relu(lin @ p["sv1_w"] + p["sv1_b"]) @ p["sv2_w"] + p["sv2_b"]
    av = jax.nn.relu(lin @ p["av1_w"] + p["av1_b"]) @ p["av2_w"] + p["av2_b"]
    return sv + (av - av.mean(axis=1, keepdims=True))


if __name__ == "__main__":
    # CartPole-like sizes: state_size=4, action_size=2.
    state_size, num_actions = 4, 2

    key = jax.random.PRNGKey(0)
    k_params, k_x1, k_x2 = jax.random.split(key, 3)
    raw = init_params(k_params, state_size, num_actions)
    packed = pack_params(raw, num_actions, dtype=jnp.float32)

    fwd = jax.jit(partial(duel_dqn_forward, num_actions=num_actions,
                          block_batch=256))

    # small batch (single grid step, tile clamped to 8 rows)
    x_small = jax.random.normal(k_x1, (8, state_size), jnp.float32)
    q_small = jax.block_until_ready(fwd(x_small, packed))
    assert q_small.shape == (8, num_actions)
    assert jnp.allclose(q_small, duel_dqn_ref(x_small, raw), atol=1e-4, rtol=1e-4), \
        "small-batch mismatch vs reference"

    # larger, non-multiple batch (exercises batch padding + multi-step parallel grid)
    x_big = jax.random.normal(k_x2, (600, state_size), jnp.float32)
    q_big = jax.block_until_ready(fwd(x_big, packed))
    assert q_big.shape == (600, num_actions)
    assert jnp.allclose(q_big, duel_dqn_ref(x_big, raw), atol=1e-4, rtol=1e-4), \
        "large-batch mismatch vs reference"

    # TODO(synk): epsilon-greedy `act()` (host RNG + argmax on one state) stays host-side.
    print("KERNEL_OK")
</pallas_src>

<mosaic_0001>
module attributes {stable_mosaic.version = 11 : i64} {
  func.func @duel_dqn_fused_kernel(%arg0: i32, %arg1: memref<8x4xf32, #tpu.memory_space<vmem>>, %arg2: memref<4x64xf32, #tpu.memory_space<vmem>>, %arg3: memref<1x64xf32, #tpu.memory_space<vmem>>, %arg4: memref<64x512xf32, #tpu.memory_space<vmem>>, %arg5: memref<1x512xf32, #tpu.memory_space<vmem>>, %arg6: memref<512x128xf32, #tpu.memory_space<vmem>>, %arg7: memref<1x128xf32, #tpu.memory_space<vmem>>, %arg8: memref<8x128xf32, #tpu.memory_space<vmem>>) attributes {dimension_semantics = [#tpu.dimension_semantics<parallel>], iteration_bounds = array<i64: 1>, scalar_prefetch = 0 : i64, scratch_operands = 0 : i64, tpu.core_type = #tpu.core_type<tc>, window_params = [{transform_indices = @transform_0, window_bounds = array<i64: 8, 4>}, {pipeline_mode = #tpu.pipeline_mode<synchronous>, transform_indices = @transform_1, window_bounds = array<i64: 4, 64>}, {pipeline_mode = #tpu.pipeline_mode<synchronous>, transform_indices = @transform_2, window_bounds = array<i64: 1, 64>}, {pipeline_mode = #tpu.pipeline_mode<synchronous>, transform_indices = @transform_3, window_bounds = array<i64: 64, 512>}, {pipeline_mode = #tpu.pipeline_mode<synchronous>, transform_indices = @transform_4, window_bounds = array<i64: 1, 512>}, {pipeline_mode = #tpu.pipeline_mode<synchronous>, transform_indices = @transform_5, window_bounds = array<i64: 512, 128>}, {pipeline_mode = #tpu.pipeline_mode<synchronous>, transform_indices = @transform_6, window_bounds = array<i64: 1, 128>}, {transform_indices = @transform_7, window_bounds = array<i64: 8, 128>}]} {
    %c0 = arith.constant 0 : index
    %c0_0 = arith.constant 0 : index
    %0 = vector.load %arg1[%c0, %c0_0] : memref<8x4xf32, #tpu.memory_space<vmem>>, vector<8x4xf32>
    %c0_1 = arith.constant 0 : index
    %c0_2 = arith.constant 0 : index
    %1 = vector.load %arg2[%c0_1, %c0_2] : memref<4x64xf32, #tpu.memory_space<vmem>>, vector<4x64xf32>
    %cst = arith.constant dense<0.000000e+00> : vector<8x64xf32>
    %2 = tpu.matmul %0, %1, %cst {dimension_numbers = #tpu.dot_dimension_numbers<[1], [0], [0], [1], [0, 0, 1, 1], [], []>} : vector<8x4xf32>, vector<4x64xf32>, vector<8x64xf32> -> vector<8x64xf32>
    %c0_3 = arith.constant 0 : index
    %c0_4 = arith.constant 0 : index
    %3 = vector.load %arg3[%c0_3, %c0_4] : memref<1x64xf32, #tpu.memory_space<vmem>>, vector<1x64xf32>
    %4 = vector.broadcast %3 : vector<1x64xf32> to vector<8x64xf32>
    %5 = arith.addf %2, %4 : vector<8x64xf32>
    %cst_5 = arith.constant 0.000000e+00 : f32
    %6 = vector.broadcast %cst_5 : f32 to vector<8x64xf32>
    %7 = arith.maximumf %5, %6 : vector<8x64xf32>
    %c0_6 = arith.constant 0 : index
    %c0_7 = arith.constant 0 : index
    %8 = vector.load %arg4[%c0_6, %c0_7] : memref<64x512xf32, #tpu.memory_space<vmem>>, vector<64x512xf32>
    %cst_8 = arith.constant dense<0.000000e+00> : vector<8x512xf32>
    %9 = tpu.matmul %7, %8, %cst_8 {dimension_numbers = #tpu.dot_dimension_numbers<[1], [0], [0], [1], [0, 0, 1, 1], [], []>} : vector<8x64xf32>, vector<64x512xf32>, vector<8x512xf32> -> vector<8x512xf32>
    %c0_9 = arith.constant 0 : index
    %c0_10 = arith.constant 0 : index
    %10 = vector.load %arg5[%c0_9, %c0_10] : memref<1x512xf32, #tpu.memory_space<vmem>>, vector<1x512xf32>
    %11 = vector.broadcast %10 : vector<1x512xf32> to vector<8x512xf32>
    %12 = arith.addf %9, %11 : vector<8x512xf32>
    %cst_11 = arith.constant 0.000000e+00 : f32
    %13 = vector.broadcast %cst_11 : f32 to vector<8x512xf32>
    %14 = arith.maximumf %12, %13 : vector<8x512xf32>
    %c0_12 = arith.constant 0 : index
    %c0_13 = arith.constant 0 : index
    %15 = vector.load %arg6[%c0_12, %c0_13] : memref<512x128xf32, #tpu.memory_space<vmem>>, vector<512x128xf32>
    %cst_14 = arith.constant dense<0.000000e+00> : vector<8x128xf32>
    %16 = tpu.matmul %14, %15, %cst_14 {dimension_numbers = #tpu.dot_dimension_numbers<[1], [0], [0], [1], [0, 0, 1, 1], [], []>} : vector<8x512xf32>, vector<512x128xf32>, vector<8x128xf32> -> vector<8x128xf32>
    %c0_15 = arith.constant 0 : index
    %c0_16 = arith.constant 0 : index
    %17 = vector.load %arg7[%c0_15, %c0_16] : memref<1x128xf32, #tpu.memory_space<vmem>>, vector<1x128xf32>
    %18 = vector.broadcast %17 : vector<1x128xf32> to vector<8x128xf32>
    %19 = arith.addf %16, %18 : vector<8x128xf32>
    %c0_17 = arith.constant 0 : index
    %c0_18 = arith.constant 0 : index
    %20 = vector.load %arg8[%c0_17, %c0_18] : memref<8x128xf32, #tpu.memory_space<vmem>>, vector<8x128xf32>
    tpu.vector_store %arg8[%c0_17, %c0_18], %19 {strides = array<i32>} : memref<8x128xf32, #tpu.memory_space<vmem>>, vector<8x128xf32>,
    return
  }
  func.func @transform_0(%arg0: i32) -> (i32, i32) {
    %c0_i32 = arith.constant 0 : i32
    %c0_i32_0 = arith.constant 0 : i32
    return %arg0, %c0_i32 : i32, i32
  }
  func.func @transform_1(%arg0: i32) -> (i32, i32) {
    %c0_i32 = arith.constant 0 : i32
    %c0_i32_0 = arith.constant 0 : i32
    %c0_i32_1 = arith.constant 0 : i32
    return %c0_i32, %c0_i32_0 : i32, i32
  }
  func.func @transform_2(%arg0: i32) -> (i32, i32) {
    %c0_i32 = arith.constant 0 : i32
    %c0_i32_0 = arith.constant 0 : i32
    %c0_i32_1 = arith.constant 0 : i32
    return %c0_i32, %c0_i32_0 : i32, i32
  }
  func.func @transform_3(%arg0: i32) -> (i32, i32) {
    %c0_i32 = arith.constant 0 : i32
    %c0_i32_0 = arith.constant 0 : i32
    %c0_i32_1 = arith.constant 0 : i32
    return %c0_i32, %c0_i32_0 : i32, i32
  }
  func.func @transform_4(%arg0: i32) -> (i32, i32) {
    %c0_i32 = arith.constant 0 : i32
    %c0_i32_0 = arith.constant 0 : i32
    %c0_i32_1 = arith.constant 0 : i32
    return %c0_i32, %c0_i32_0 : i32, i32
  }
  func.func @transform_5(%arg0: i32) -> (i32, i32) {
    %c0_i32 = arith.constant 0 : i32
    %c0_i32_0 = arith.constant 0 : i32
    %c0_i32_1 = arith.constant 0 : i32
    return %c0_i32, %c0_i32_0 : i32, i32
  }
  func.func @transform_6(%arg0: i32) -> (i32, i32) {
    %c0_i32 = arith.constant 0 : i32
    %c0_i32_0 = arith.constant 0 : i32
    %c0_i32_1 = arith.constant 0 : i32
    return %c0_i32, %c0_i32_0 : i32, i32
  }
  func.func @transform_7(%arg0: i32) -> (i32, i32) {
    %c0_i32 = arith.constant 0 : i32
    %c0_i32_0 = arith.constant 0 : i32
    return %arg0, %c0_i32 : i32, i32
  }
}

</mosaic_0001>

<bundles_post_ra>
// kernel: duel_dqn_forward.1
= control target key start
LH: loop header
LB: loop body
LE: loop exit
PB: predicated region body
PF: predicated region fallthrough
CT: control target
= control target key end

     0   :  { %12 = vsyncpa [#allocation3], 0  ;;  %s889_s0 = inlined_call_operand.vmem [shape: f32[8,4], index: 0, kind: input, shape index: {}]   ;;  %s890_s1 = inlined_call_operand.vmem [shape: f32[4,64], index: 1, kind: input, shape index: {}]   ;;  %s891_s2 = inlined_call_operand.vmem [shape: f32[1,64], index: 2, kind: input, shape index: {}]   ;;  %s892_s3 = inlined_call_operand.hbm [shape: f32[64,512], index: 3, kind: input, shape index: {}]   ;;  %s893_s4 = inlined_call_operand.vmem [shape: f32[1,512], index: 4, kind: input, shape index: {}]   ;;  %s894_s5 = inlined_call_operand.hbm [shape: f32[512,128], index: 5, kind: input, shape index: {}]   ;;  %s895_s6 = inlined_call_operand.vmem [shape: f32[1,128], index: 6, kind: input, shape index: {}]   ;;  %s896_s7 = inlined_call_operand.vmem [shape: f32[8,128], index: 7, kind: output, shape index: {}]  }
   0x1   :  { %13 = vsyncpa [#allocation5], 0  ;;  %s799_s24 = smov [#allocation2]   ;;  %s751_s28 = scalar_lea.hbm %s892_s3, 4096 }
   0x2   :  { %s25_s25 = sshll.u32 %s799_s24, 4  ;;  %p752_p0 = scmp.ne.s32.totalorder %s892_s3, %s751_s28  ;;  %s26_s25 = int_to_ptr.vmem [resolvable:$true] %s25_s25 }
   0x3   :  { %p755_p1 = scmp.lt.u32.totalorder %s751_s28, %s892_s3 }
   0x5   :  { %p757_p2 = pnand %p755_p1, %p752_p0 }
   0x7   :  { %760 = shalt.err (!%p757_p2)
}
   0x8   :  { %s761_s10 = scalar_lea.vmem %s26_s25, 4096  ;;  %p766_p4 = scmp.lt.s32.totalorder %s26_s25, %s26_s25 }
   0x9   :  { %p762_p3 = scmp.ne.s32.totalorder %s26_s25, %s761_s10  ;;  %p767_p5 = scmp.lt.s32.totalorder %s761_s10, %s761_s10 }
   0xb   :  { %p768_p6 = por %p767_p5, %p766_p4 }
   0xd   :  { %p769_p7 = pnand %p768_p6, %p762_p3 }
   0xf   :  { %772 = shalt.err (!%p769_p7)
}
  0x10   :  { %s800_s11 = smov 512   ;;  %s801_s12 = smov 32  }
  0x11   :  { %31 = dma.hbm_to_vmem [thread:$0]  %s892_s3, 4096, %s26_s25, [#allocation3], %s800_s11, %s800_s11, %s801_s12  }
  0x12   :  { %s802_s15 = smov [#allocation4]   ;;  %s773_s19 = scalar_lea.hbm %s894_s5, 8192 }
  0x13   :  { %s39_s16 = sshll.u32 %s802_s15, 4  ;;  %p774_p8 = scmp.ne.s32.totalorder %s894_s5, %s773_s19  ;;  %s40_s16 = int_to_ptr.vmem [resolvable:$true] %s39_s16 }
  0x14   :  { %p777_p9 = scmp.lt.u32.totalorder %s773_s19, %s894_s5 }
  0x16   :  { %p779_p10 = pnand %p777_p9, %p774_p8 }
  0x18   :  { %782 = shalt.err (!%p779_p10)
}
  0x19   :  { %s783_s24 = scalar_lea.vmem %s40_s16, 8192  ;;  %p788_p12 = scmp.lt.s32.totalorder %s40_s16, %s40_s16 }
  0x1a   :  { %p784_p11 = scmp.ne.s32.totalorder %s40_s16, %s783_s24  ;;  %p789_p13 = scmp.lt.s32.totalorder %s783_s24, %s783_s24 }
  0x1c   :  { %p790_p0 = por %p789_p13, %p788_p12 }
  0x1e   :  { %p791_p1 = pnand %p790_p0, %p784_p11 }
  0x20   :  { %794 = shalt.err (!%p791_p1)
}
  0x21   :  { %s803_s3 = smov 128   ;;  %s804_s25 = smov 8  }
  0x22   :  { %45 = dma.hbm_to_vmem [thread:$0]  %s894_s5, 8192, %s40_s16, [#allocation5], %s803_s3, %s803_s3, %s804_s25  }
  0x23   :  { %795 = dma.done.wait [#allocation3], 4096  }
  0x24   :  { %796 = vsyncadd [#allocation3], 4294963200 }
  0x25   :  { %797 = dma.done.wait [#allocation5], 8192  }
  0x26   :  { %798 = vsyncadd [#allocation5], 4294959104  ;;  %v805_v0 = vmov 0.0   ;;  %vm806_vm0 = vmmov 0   ;;  %vm67_vm1 = vcmask 1043456   ;;  %vm63_vm2 = vcmask 31744  }
  0x27   :  { %642 = vmatprep.subr.mxu0 %v805_v0  ;;  %644 = vmatprep.mubr.msk.f32.mxu0 %vm806_vm0, %v805_v0  ;;  %v55_v1 = vld [vmem:[%s890_s1] sm:$0xf]  ;;  %v143_v3 = vld [vmem:[#allocation2 + $0x8] sm:$0xff]  ;;  %v145_v5 = vld [vmem:[#allocation2 + $0x18] sm:$0xff]  ;;  %vm196_vm3 = vcmask 523264  }
  0x28   :  { %264 = vmatprep.mubr.f32.mxu1 %v805_v0  ;;  %v54_v2 = vld [vmem:[%s889_s0] sm:$0xff]  ;;  %643 = vmatpush3.msk.msra.mxu0 %vm67_vm1, %v55_v1  ;;  %v147_v4 = vld [vmem:[#allocation2 + $0x28] sm:$0xff]  ;;  %v149_v6 = vld [vmem:[#allocation2 + $0x38] sm:$0xff] }
  0x29   :  { %645 = vmatmul.mubr.msk.f32.vlgmr.msra.gmra.mrb[0].mxu0 %vm63_vm2, %v54_v2  ;;  %v647_v7 = vpack.c.bf16 %v147_v4, %v143_v3  ;;  %v663_v8 = vpack.c.bf16 %v149_v6, %v145_v5  ;;  %v142_v9 = vld [vmem:[#allocation2] sm:$0xff]  ;;  %v144_v11 = vld [vmem:[#allocation2 + $0x10] sm:$0xff]  ;;  %v151_v14 = vld [vmem:[#allocation2 + $0x48] sm:$0xff] }
  0x2a   :  { %v146_v10 = vld [vmem:[#allocation2 + $0x20] sm:$0xff]  ;;  %v148_v13 = vld [vmem:[#allocation2 + $0x30] sm:$0xff]  ;;  %v155_v15 = vld [vmem:[#allocation2 + $0x68] sm:$0xff]  ;;  %335 = vmatprep.mubr.f32.mxu0 %v805_v0 }
  0x2b   :  { %v649_v12 = vpack.c.bf16 %v146_v10, %v142_v9  ;;  %648 = vmatprep.subr.bf16.mxu1 %v647_v7  ;;  %664 = vmatprep.subr.bf16.mxu0 %v663_v8  ;;  %v665_v16 = vpack.c.bf16 %v148_v13, %v144_v11  ;;  %v651_v17 = vpack.c.bf16 %v155_v15, %v151_v14  ;;  %v153_v18 = vld [vmem:[#allocation2 + $0x58] sm:$0xff]  ;;  %v150_v20 = vld [vmem:[#allocation2 + $0x40] sm:$0xff]  ;;  %v152_v23 = vld [vmem:[#allocation2 + $0x50] sm:$0xff] }
  0x2c   :  { %v157_v19 = vld [vmem:[#allocation2 + $0x78] sm:$0xff]  ;;  %v154_v22 = vld [vmem:[#allocation2 + $0x60] sm:$0xff]  ;;  %v156_v24 = vld [vmem:[#allocation2 + $0x70] sm:$0xff] }
  0x2d   :  { %650 = vmatpush1.bf16.msra.mxu1 %v649_v12  ;;  %v667_v21 = vpack.c.bf16 %v157_v19, %v153_v18  ;;  %666 = vmatpush1.bf16.msra.mxu0 %v665_v16  ;;  %v653_v25 = vpack.c.bf16 %v154_v22, %v150_v20  ;;  %v669_v26 = vpack.c.bf16 %v156_v24, %v152_v23  ;;  %v159_v27 = vld [vmem:[#allocation2 + $0x88] sm:$0xff]  ;;  %v161_v29 = vld [vmem:[#allocation2 + $0x98] sm:$0xff]  ;;  %v158_v32 = vld [vmem:[#allocation2 + $0x80] sm:$0xff] }
  0x2e   :  { %652 = vmatprep.subr.bf16.mxu1 %v651_v17  ;;  %v163_v28 = vld [vmem:[#allocation2 + $0xa8] sm:$0xff]  ;;  %v165_v31 = vld [vmem:[#allocation2 + $0xb8] sm:$0xff]  ;;  %v162_v33 = vld [vmem:[#allocation2 + $0xa0] sm:$0xff] }
  0x2f   :  { %668 = vmatprep.subr.bf16.mxu0 %v667_v21  ;;  %v655_v30 = vpack.c.bf16 %v163_v28, %v159_v27  ;;  %v671_v34 = vpack.c.bf16 %v165_v31, %v161_v29  ;;  %v160_v35 = vld [vmem:[#allocation2 + $0x90] sm:$0xff]  ;;  %v657_v37 = vpack.c.bf16 %v162_v33, %v158_v32  ;;  %v167_v39 = vld [vmem:[#allocation2 + $0xc8] sm:$0xff]  ;;  %v169_v41 = vld [vmem:[#allocation2 + $0xd8] sm:$0xff] }
  0x30   :  { %v164_v36 = vld [vmem:[#allocation2 + $0xb0] sm:$0xff]  ;;  %v171_v40 = vld [vmem:[#allocation2 + $0xe8] sm:$0xff]  ;;  %v173_v43 = vld [vmem:[#allocation2 + $0xf8] sm:$0xff] }
  0x31   :  { %654 = vmatpush1.bf16.msra.mxu1 %v653_v25  ;;  %670 = vmatpush1.bf16.msra.mxu0 %v669_v26  ;;  %v673_v38 = vpack.c.bf16 %v164_v36, %v160_v35  ;;  %v659_v42 = vpack.c.bf16 %v171_v40, %v167_v39  ;;  %v166_v44 = vld [vmem:[#allocation2 + $0xc0] sm:$0xff]  ;;  %v675_v46 = vpack.c.bf16 %v173_v43, %v169_v41  ;;  %v168_v48 = vld [vmem:[#allocation2 + $0xd0] sm:$0xff]  ;;  %v363_v52 = vld [vmem:[#allocation4 + $0x88] sm:$0xff] }
  0x32   :  { %656 = vmatprep.subr.bf16.mxu1 %v655_v30  ;;  %672 = vmatprep.subr.bf16.mxu0 %v671_v34  ;;  %v170_v45 = vld [vmem:[#allocation2 + $0xe0] sm:$0xff]  ;;  %v172_v49 = vld [vmem:[#allocation2 + $0xf0] sm:$0xff]  ;;  %v395_v55 = vld [vmem:[#allocation4 + $0x188] sm:$0xff] }
  0x33   :  { %v661_v47 = vpack.c.bf16 %v170_v45, %v166_v44  ;;  %v677_v50 = vpack.c.bf16 %v172_v49, %v168_v48  ;;  %v362_v51 = vld [vmem:[#allocation4 + $0x80] sm:$0xff]  ;;  %v347_v59 = vld [vmem:[#allocation4 + $0x8] sm:$0xff]  ;;  %v364_v62 = vld [vmem:[#allocation4 + $0x90] sm:$0xff] }
  0x34   :  { %v394_v53 = vld [vmem:[#allocation4 + $0x180] sm:$0xff]  ;;  %v679_v54 = vpack.c.bf16 %v363_v52, %v362_v51  ;;  %v379_v61 = vld [vmem:[#allocation4 + $0x108] sm:$0xff]  ;;  %v365_v0 = vld [vmem:[#allocation4 + $0x98] sm:$0xff] }
  0x35   :  { %658 = vmatpush1.bf16.msra.mxu1 %v657_v37  ;;  %674 = vmatpush1.bf16.msra.mxu0 %v673_v38  ;;  %v711_v56 = vpack.c.bf16 %v395_v55, %v394_v53  ;;  %v564_v57 = vld [vmem:[%s891_s2] ss:$0 sm:$0xff]  ;;  %v396_v1 = vld [vmem:[#allocation4 + $0x190] sm:$0xff]  ;;  %v397_v2 = vld [vmem:[#allocation4 + $0x198] sm:$0xff]  ;;  %v683_v10 = vpack.c.bf16 %v365_v0, %v364_v62 }
  0x36   :  { %660 = vmatprep.subr.bf16.mxu1 %v659_v42  ;;  %676 = vmatprep.subr.bf16.mxu0 %v675_v46  ;;  %v346_v58 = vld [vmem:[#allocation4] sm:$0xff]  ;;  %v348_v7 = vld [vmem:[#allocation4 + $0x10] sm:$0xff]  ;;  %v349_v8 = vld [vmem:[#allocation4 + $0x18] sm:$0xff]  ;;  %v715_v11 = vpack.c.bf16 %v397_v2, %v396_v1 }
  0x37   :  { %v378_v60 = vld [vmem:[#allocation4 + $0x100] sm:$0xff]  ;;  %v681_v5 = vpack.c.bf16 %v347_v59, %v346_v58  ;;  %v380_v12 = vld [vmem:[#allocation4 + $0x110] sm:$0xff]  ;;  %v381_v13 = vld [vmem:[#allocation4 + $0x118] sm:$0xff]  ;;  %v685_v18 = vpack.c.bf16 %v349_v8, %v348_v7 }
  0x38   :  { %v713_v6 = vpack.c.bf16 %v379_v61, %v378_v60  ;;  %v366_v14 = vld [vmem:[#allocation4 + $0xa0] sm:$0xff]  ;;  %v367_v15 = vld [vmem:[#allocation4 + $0xa8] sm:$0xff]  ;;  %v717_v19 = vpack.c.bf16 %v381_v13, %v380_v12  ;;  %v368_v26 = vld [vmem:[#allocation4 + $0xb0] sm:$0xff] }
  0x39   :  { %662 = vmatpush1.bf16.msra.mxu1 %v661_v47  ;;  %678 = vmatpush1.bf16.msra.mxu0 %v677_v50  ;;  %v398_v16 = vld [vmem:[#allocation4 + $0x1a0] sm:$0xff]  ;;  %v399_v17 = vld [vmem:[#allocation4 + $0x1a8] sm:$0xff]  ;;  %v687_v22 = vpack.c.bf16 %v367_v15, %v366_v14  ;;  %v369_v27 = vld [vmem:[#allocation4 + $0xb8] sm:$0xff] }
  0x3a   :  { %680 = vmatprep.subr.bf16.mxu1 %v679_v54  ;;  %712 = vmatprep.subr.bf16.mxu0 %v711_v56  ;;  %v350_v20 = vld [vmem:[#allocation4 + $0x20] sm:$0xff]  ;;  %v351_v21 = vld [vmem:[#allocation4 + $0x28] sm:$0xff]  ;;  %v719_v23 = vpack.c.bf16 %v399_v17, %v398_v16  ;;  %v400_v28 = vld [vmem:[#allocation4 + $0x1b0] sm:$0xff]  ;;  %v691_v34 = vpack.c.bf16 %v369_v27, %v368_v26 }
  0x3b   :  { %v382_v24 = vld [vmem:[#allocation4 + $0x120] sm:$0xff]  ;;  %v383_v25 = vld [vmem:[#allocation4 + $0x128] sm:$0xff]  ;;  %v401_v29 = vld [vmem:[#allocation4 + $0x1b8] sm:$0xff]  ;;  %v689_v30 = vpack.c.bf16 %v351_v21, %v350_v20 }
  0x3c   :  { %v721_v31 = vpack.c.bf16 %v383_v25, %v382_v24  ;;  %v352_v32 = vld [vmem:[#allocation4 + $0x30] sm:$0xff]  ;;  %v353_v33 = vld [vmem:[#allocation4 + $0x38] sm:$0xff]  ;;  %v723_v35 = vpack.c.bf16 %v401_v29, %v400_v28  ;;  %v370_v38 = vld [vmem:[#allocation4 + $0xc0] sm:$0xff]  ;;  %v176_v24 = vlaneseq }
  0x3d   :  { %v384_v36 = vld [vmem:[#allocation4 + $0x130] sm:$0xff]  ;;  %v385_v37 = vld [vmem:[#allocation4 + $0x138] sm:$0xff]  ;;  %v371_v39 = vld [vmem:[#allocation4 + $0xc8] sm:$0xff]  ;;  %v693_v42 = vpack.c.bf16 %v353_v33, %v352_v32 }
  0x3e   :  { %v402_v40 = vld [vmem:[#allocation4 + $0x1c0] sm:$0xff]  ;;  %v403_v41 = vld [vmem:[#allocation4 + $0x1c8] sm:$0xff]  ;;  %v725_v43 = vpack.c.bf16 %v385_v37, %v384_v36  ;;  %v695_v46 = vpack.c.bf16 %v371_v39, %v370_v38  ;;  %v372_v50 = vld [vmem:[#allocation4 + $0xd0] sm:$0xff]  ;;  %v177_v25 = vshrl.u32 %v176_v24, 7 }
  0x3f   :  { %v354_v44 = vld [vmem:[#allocation4 + $0x40] sm:$0xff]  ;;  %v355_v45 = vld [vmem:[#allocation4 + $0x48] sm:$0xff]  ;;  %v727_v47 = vpack.c.bf16 %v403_v41, %v402_v40  ;;  %v373_v51 = vld [vmem:[#allocation4 + $0xd8] sm:$0xff] }
  0x40   :  { %v386_v48 = vld [vmem:[#allocation4 + $0x140] sm:$0xff]  ;;  %v387_v49 = vld [vmem:[#allocation4 + $0x148] sm:$0xff]  ;;  %v404_v52 = vld [vmem:[#allocation4 + $0x1d0] sm:$0xff]  ;;  %v697_v54 = vpack.c.bf16 %v355_v45, %v354_v44  ;;  %v699_v58 = vpack.c.bf16 %v373_v51, %v372_v50  ;;  %v178_v26 = vsub.s32 0, %v177_v25  ;;  %v186_v27 = vsub.s32 2, %v177_v25 }
  0x41   :  { %v405_v53 = vld [vmem:[#allocation4 + $0x1d8] sm:$0xff]  ;;  %v729_v55 = vpack.c.bf16 %v387_v49, %v386_v48  ;;  %v356_v56 = vld [vmem:[#allocation4 + $0x50] sm:$0xff]  ;;  %v374_v62 = vld [vmem:[#allocation4 + $0xe0] sm:$0xff]  ;;  %v182_v29 = vsub.s32 1, %v177_v25 }
  0x42   :  { %v731_v59 = vpack.c.bf16 %v405_v53, %v404_v52  ;;  %v388_v60 = vld [vmem:[#allocation4 + $0x150] sm:$0xff]  ;;  %v389_v61 = vld [vmem:[#allocation4 + $0x158] sm:$0xff]  ;;  %v406_v0 = vld [vmem:[#allocation4 + $0x1e0] sm:$0xff] }
  0x43   :  { %v407_v1 = vld [vmem:[#allocation4 + $0x1e8] sm:$0xff]  ;;  %v390_v8 = vld [vmem:[#allocation4 + $0x160] sm:$0xff]  ;;  %v376_v12 = vld [vmem:[#allocation4 + $0xf0] sm:$0xff] }
  0x44   :  { %v359_v7 = vld [vmem:[#allocation4 + $0x68] sm:$0xff]  ;;  %v377_v13 = vld [vmem:[#allocation4 + $0xf8] sm:$0xff]  ;;  %v408_v14 = vld [vmem:[#allocation4 + $0x1f0] sm:$0xff] }
  0x45   :  { %v707_v15 = vpack.c.bf16 %v377_v13, %v376_v12  ;;  %v409_v16 = vld [vmem:[#allocation4 + $0x1f8] sm:$0xff]  ;;  %v360_v17 = vld [vmem:[#allocation4 + $0x70] sm:$0xff]  ;;  %v174_v28 = vld [vmem:[%s893_s4] sm:$0xf] }
  0x46   :  { %v392_v21 = vld [vmem:[#allocation4 + $0x170] sm:$0xff]  ;;  %v187_v32 = vrot.slane %v174_v28, %v186_v27  ;;  %v183_v33 = vrot.slane %v174_v28, %v182_v29  ;;  %v569_v49 = vld [vmem:[%s895_s6] ss:$0 sm:$0xff] }
  0xfc   :  { %v137_v63 = vpop.f32.mrb[0].mxu0 }
  0xfd   :  { %v138_v3 = vadd.f32 %v564_v57, %v137_v63  ;;  %v646_v4 = vpop.f32.mrb[1].mxu0  ;;  %v357_v57 = vld [vmem:[#allocation4 + $0x58] sm:$0xff]  ;;  %v375_v63 = vld [vmem:[#allocation4 + $0xe8] sm:$0xff] }
  0xfe   :  { %v701_v2 = vpack.c.bf16 %v357_v57, %v356_v56  ;;  %v703_v4 = vpack.c.bf16 %v375_v63, %v374_v62 }
  0xff   :  { %v141_v9 = vmax.f32 %v138_v3, 0.0  ;;  %v733_v3 = vpack.c.bf16 %v389_v61, %v388_v60 }
 0x101   :  { %567 = vmatmul.mubr.msk.f32.vlgmr.msra.gmra.mrb[0].mxu1 %vm196_vm3, %v141_v9  ;;  %568 = vmatmul.mubr.msk.f32.vlgmr.msra.gmra.mrb[2].mxu0 %vm196_vm3, %v141_v9 }
 0x102   :  { %682 = vmatpush3.bf16.msra.mxu1 %v681_v5  ;;  %714 = vmatpush3.bf16.msra.mxu0 %v713_v6  ;;  %v735_v5 = vpack.c.bf16 %v407_v1, %v406_v0  ;;  %v358_v6 = vld [vmem:[#allocation4 + $0x60] sm:$0xff] }
 0x103   :  { %684 = vmatprep.subr.bf16.mxu1 %v683_v10  ;;  %716 = vmatprep.subr.bf16.mxu0 %v715_v11  ;;  %v705_v9 = vpack.c.bf16 %v359_v7, %v358_v6  ;;  %v391_v10 = vld [vmem:[#allocation4 + $0x168] sm:$0xff] }
 0x104   :  { %v737_v11 = vpack.c.bf16 %v391_v10, %v390_v8 }
 0x106   :  { %686 = vmatpush3.bf16.msra.mxu1 %v685_v18  ;;  %718 = vmatpush3.bf16.msra.mxu0 %v717_v19  ;;  %v361_v18 = vld [vmem:[#allocation4 + $0x78] sm:$0xff]  ;;  %v739_v19 = vpack.c.bf16 %v409_v16, %v408_v14 }
 0x107   :  { %688 = vmatprep.subr.bf16.mxu1 %v687_v22  ;;  %720 = vmatprep.subr.bf16.mxu0 %v719_v23  ;;  %v709_v20 = vpack.c.bf16 %v361_v18, %v360_v17  ;;  %v393_v22 = vld [vmem:[#allocation4 + $0x178] sm:$0xff] }
 0x108   :  { %v741_v23 = vpack.c.bf16 %v393_v22, %v392_v21 }
 0x10a   :  { %690 = vmatpush3.bf16.msra.mxu1 %v689_v30  ;;  %722 = vmatpush3.bf16.msra.mxu0 %v721_v31  ;;  %v190_v30 = vsub.s32 3, %v177_v25  ;;  %v179_v31 = vrot.slane %v174_v28, %v178_v26 }
 0x10b   :  { %692 = vmatprep.subr.bf16.mxu1 %v691_v34  ;;  %724 = vmatprep.subr.bf16.mxu0 %v723_v35 }
 0x10c   :  { %v191_v34 = vrot.slane %v174_v28, %v190_v30 }
 0x10e   :  { %694 = vmatpush3.bf16.msra.mxu1 %v693_v42  ;;  %726 = vmatpush3.bf16.msra.mxu0 %v725_v43 }
 0x10f   :  { %696 = vmatprep.subr.bf16.mxu1 %v695_v46  ;;  %728 = vmatprep.subr.bf16.mxu0 %v727_v47 }
 0x112   :  { %698 = vmatpush3.bf16.msra.mxu1 %v697_v54  ;;  %730 = vmatpush3.bf16.msra.mxu0 %v729_v55 }
 0x113   :  { %700 = vmatprep.subr.bf16.mxu1 %v699_v58  ;;  %732 = vmatprep.subr.bf16.mxu0 %v731_v59 }
 0x116   :  { %702 = vmatpush3.bf16.msra.mxu1 %v701_v2  ;;  %734 = vmatpush3.bf16.msra.mxu0 %v733_v3 }
 0x117   :  { %704 = vmatprep.subr.bf16.mxu1 %v703_v4  ;;  %736 = vmatprep.subr.bf16.mxu0 %v735_v5 }
 0x11a   :  { %706 = vmatpush3.bf16.msra.mxu1 %v705_v9  ;;  %738 = vmatpush3.bf16.msra.mxu0 %v737_v11 }
 0x11b   :  { %708 = vmatprep.subr.bf16.mxu1 %v707_v15  ;;  %740 = vmatprep.subr.bf16.mxu0 %v739_v19 }
 0x11e   :  { %710 = vmatpush3.bf16.msra.mxu1 %v709_v20  ;;  %742 = vmatpush3.bf16.msra.mxu0 %v741_v23 }
 0x1d4   :  { %v266_v35 = vpop.f32.mrb[0].mxu1  ;;  %v337_v36 = vpop.f32.mrb[2].mxu0 }
 0x1d5   :  { %v267_v37 = vadd.f32 %v266_v35, %v179_v31  ;;  %v338_v38 = vadd.f32 %v337_v36, %v187_v32  ;;  %v268_v39 = vpop.f32.mrb[1].mxu1  ;;  %v339_v40 = vpop.f32.mrb[3].mxu0 }
 0x1d6   :  { %v269_v41 = vadd.f32 %v268_v39, %v183_v33  ;;  %v340_v42 = vadd.f32 %v339_v40, %v191_v34 }
 0x1d7   :  { %v342_v45 = vmax.f32 %v267_v37, 0.0  ;;  %v344_v46 = vmax.f32 %v338_v38, 0.0 }
 0x1d8   :  { %v343_v43 = vmax.f32 %v269_v41, 0.0  ;;  %v345_v44 = vmax.f32 %v340_v42, 0.0 }
 0x1da   :  { %481 = vmatprep.mubr.f32.mxu1 %v343_v43  ;;  %551 = vmatprep.mubr.f32.mxu0 %v345_v44 }
 0x1db   :  { %482 = vmatmul.mubr.f32.vlgmr.msra.gmra.mrb[2].mxu1 %v342_v45  ;;  %552 = vmatmul.mubr.f32.vlgmr.msra.gmra.mrb[4].mxu0 %v344_v46 }
 0x2ae   :  { %v604_v47 = vpop.f32.mrb[2].mxu1  ;;  %v639_v48 = vpop.f32.mrb[4].mxu0 }
 0x2af   :  { %v605_v50 = vpop.f32.mrb[3].mxu1  ;;  %v640_v51 = vpop.f32.mrb[5].mxu0 }
 0x2b0   :  { %v606_v52 = vadd.f32 %v605_v50, %v604_v47  ;;  %v641_v53 = vadd.f32 %v640_v51, %v639_v48 }
 0x2b2   :  { %v484_v54 = vadd.f32 %v606_v52, %v569_v49 }
 0x2b4   :  { %v554_v55 = vadd.f32 %v641_v53, %v484_v54 }
 0x2b6   :  { %557 = vst [vmem:[%s896_s7] sm:$0xff] %v554_v55 }
 0x2b7   :  { %562 = vsyncpa [#allocation3], 1 }
 0x2b8   :  { %563 = vsyncpa [#allocation5], 1 }

</bundles_post_ra>
